<compile_context>
chip_gen: v5e
topology: v5e:2x2
jax: 0.10.0
libtpu: 0.0.40
codegen_flags: <defaults>
</compile_context>

<pallas_src>
import functools

import jax
import jax.numpy as jnp
from jax.experimental import pallas as pl
from jax.experimental.pallas import tpu as pltpu

LANES = 128
SUBLANES = 8
# Per-input-tile byte budget per grid step.  2 inputs x 2 pipeline buffers
# x 2 MiB = 8 MiB of pipeline VMEM, leaving headroom for elementwise
# temporaries inside the 32 MiB limit below (safe on v5e/v6e/v7x).
TILE_BYTE_BUDGET = 2 * 1024 * 1024
VMEM_LIMIT_BYTES = 32 * 1024 * 1024


def _mse_partial_kernel(x_ref, t_ref, out_ref, *, total_rows, block_rows,
                        need_mask):
    """Writes this block's partial sum of (t - sigmoid(x))**2.

    The (1, 8, 128) output block is filled with the (1, 128) lane-vector
    partial broadcast across sublanes; the wrapper reads row 0 only.
    """
    x = x_ref[...].astype(jnp.float32)
    t = t_ref[...].astype(jnp.float32)

    # sigmoid(x) = 0.5 * tanh(0.5 * x) + 0.5  (single EUP op + cheap VALU).
    rec = 0.5 * jnp.tanh(0.5 * x) + 0.5
    d = t - rec
    dd = d * d

    def write_partial(vals):
        s = jnp.sum(vals, axis=0, keepdims=True)            # (1, LANES)
        out_ref[...] = jnp.broadcast_to(s.reshape(1, 1, LANES),
                                        (1, SUBLANES, LANES))

    if need_mask:
        # Only the last block is ragged; keep masking off the hot path.
        is_last = pl.program_id(0) == pl.num_programs(0) - 1

        @pl.when(is_last)
        def _():
            row0 = pl.program_id(0) * block_rows
            rid = jax.lax.broadcasted_iota(jnp.int32, dd.shape, 0) + row0
            write_partial(jnp.where(rid < total_rows, dd, 0.0))

        @pl.when(jnp.logical_not(is_last))
        def _():
            write_partial(dd)
    else:
        write_partial(dd)


def mse_loss(x, target, size_average=True):
    assert x.shape == target.shape
    numel = x.size

    xf = x.reshape(-1)
    tf = target.reshape(-1)

    # Lane-aligned main slab; the (<128-element) ragged tail is summed with
    # plain jnp here -- no padded copy of the inputs in HBM.
    main = (numel // LANES) * LANES
    rows = main // LANES

    total = jnp.float32(0.0)
    if main < numel:
        xt = xf[main:].astype(jnp.float32)
        tt = tf[main:].astype(jnp.float32)
        total = total + jnp.sum((tt - jax.nn.sigmoid(xt)) ** 2)

    if rows > 0:
        x2 = xf[:main].reshape(rows, LANES)
        t2 = tf[:main].reshape(rows, LANES)

        # Byte-budgeted tile: constant HBM bytes per grid step regardless of
        # dtype (bf16 -> 2x rows, int8 -> 4x rows).  Rounded to a multiple of
        # 32 rows so non-final blocks satisfy any dtype's sublane tiling.
        bytes_per_row = LANES * max(x2.dtype.itemsize, t2.dtype.itemsize)
        budget_rows = max(32, (TILE_BYTE_BUDGET // bytes_per_row) // 32 * 32)

        block_rows = rows if rows <= budget_rows else budget_rows
        n_blocks = pl.cdiv(rows, block_rows)
        need_mask = (rows % block_rows) != 0

        kernel = functools.partial(
            _mse_partial_kernel,
            total_rows=rows,
            block_rows=block_rows,
            need_mask=need_mask,
        )

        in_bytes = main * (x2.dtype.itemsize + t2.dtype.itemsize)
        cost = pl.CostEstimate(
            flops=5 * main,
            transcendentals=main,
            bytes_accessed=in_bytes + n_blocks * SUBLANES * LANES * 4,
        )

        partials = pl.pallas_call(
            kernel,
            out_shape=jax.ShapeDtypeStruct((n_blocks, SUBLANES, LANES),
                                           jnp.float32),
            grid_spec=pltpu.PrefetchScalarGridSpec(
                num_scalar_prefetch=0,
                grid=(n_blocks,),
                in_specs=[
                    pl.BlockSpec((block_rows, LANES), lambda i: (i, 0)),
                    pl.BlockSpec((block_rows, LANES), lambda i: (i, 0)),
                ],
                out_specs=pl.BlockSpec((1, SUBLANES, LANES),
                                       lambda i: (i, 0, 0)),
            ),
            compiler_params=pltpu.CompilerParams(
                # Independent per-block partials -> megacore shards the grid
                # across both TensorCores on v7x; free on single-TC chips.
                dimension_semantics=("parallel",),
                vmem_limit_bytes=VMEM_LIMIT_BYTES,
            ),
            cost_estimate=cost,
        )(x2, t2)

        # Row 0 of each block's (8, 128) output holds its lane-vector partial.
        total = total + jnp.sum(partials[:, 0, :])

    if size_average:
        total = total / numel
    return total


def _reference(x, target, size_average=True):
    rec = jax.nn.sigmoid(x.astype(jnp.float32))
    loss = jnp.sum((target.astype(jnp.float32) - rec) ** 2)
    if size_average:
        loss = loss / target.size
    return loss


if __name__ == "__main__":
    key = jax.random.PRNGKey(0)
    k1, k2 = jax.random.split(key)
    # NCHW, small shapes: batch=2, channels=4, spatial=16
    x = jax.random.normal(k1, (2, 4, 16, 16), dtype=jnp.float32)
    target = jax.random.uniform(k2, (2, 4, 16, 16), dtype=jnp.float32)

    loss = mse_loss(x, target, size_average=True)
    jax.block_until_ready(loss)
    ref = _reference(x, target, size_average=True)
    assert jnp.allclose(loss, ref, rtol=2e-3, atol=1e-6), (loss, ref)

    # Also exercise size_average=False path.
    loss_sum = mse_loss(x, target, size_average=False)
    jax.block_until_ready(loss_sum)
    ref_sum = _reference(x, target, size_average=False)
    assert jnp.allclose(loss_sum, ref_sum, rtol=2e-3, atol=1e-4), (loss_sum, ref_sum)

    print("KERNEL_OK")
</pallas_src>

<mosaic_0001>
module attributes {stable_mosaic.version = 11 : i64} {
  func.func @_mse_partial_kernel(%arg0: i32, %arg1: memref<16x128xf32, #tpu.memory_space<vmem>>, %arg2: memref<16x128xf32, #tpu.memory_space<vmem>>, %arg3: memref<1x8x128xf32, #tpu.memory_space<vmem>>) attributes {dimension_semantics = [#tpu.dimension_semantics<parallel>], iteration_bounds = array<i64: 1>, scalar_prefetch = 0 : i64, scratch_operands = 0 : i64, tpu.core_type = #tpu.core_type<tc>, window_params = [{transform_indices = @transform_0, window_bounds = array<i64: 16, 128>}, {transform_indices = @transform_1, window_bounds = array<i64: 16, 128>}, {transform_indices = @transform_2, window_bounds = array<i64: 1, 8, 128>}]} {
    %c0 = arith.constant 0 : index
    %c0_0 = arith.constant 0 : index
    %0 = vector.load %arg1[%c0, %c0_0] : memref<16x128xf32, #tpu.memory_space<vmem>>, vector<16x128xf32>
    %c0_1 = arith.constant 0 : index
    %c0_2 = arith.constant 0 : index
    %1 = vector.load %arg2[%c0_1, %c0_2] : memref<16x128xf32, #tpu.memory_space<vmem>>, vector<16x128xf32>
    %cst = arith.constant 5.000000e-01 : f32
    %2 = vector.broadcast %cst : f32 to vector<16x128xf32>
    %3 = arith.mulf %2, %0 : vector<16x128xf32>
    %4 = math.tanh %3 : vector<16x128xf32>
    %cst_3 = arith.constant 5.000000e-01 : f32
    %5 = vector.broadcast %cst_3 : f32 to vector<16x128xf32>
    %6 = arith.mulf %5, %4 : vector<16x128xf32>
    %cst_4 = arith.constant 5.000000e-01 : f32
    %7 = vector.broadcast %cst_4 : f32 to vector<16x128xf32>
    %8 = arith.addf %6, %7 : vector<16x128xf32>
    %9 = arith.subf %1, %8 : vector<16x128xf32>
    %10 = arith.mulf %9, %9 : vector<16x128xf32>
    %cst_5 = arith.constant dense<0.000000e+00> : vector<128xf32>
    %11 = vector.multi_reduction <add>, %10, %cst_5 [0] : vector<16x128xf32> to vector<128xf32>
    %12 = vector.shape_cast %11 : vector<128xf32> to vector<1x128xf32>
    %13 = vector.shape_cast %12 : vector<1x128xf32> to vector<1x1x128xf32>
    %14 = vector.shape_cast %13 : vector<1x1x128xf32> to vector<1x1x128xf32>
    %15 = vector.broadcast %14 : vector<1x1x128xf32> to vector<1x8x128xf32>
    %c0_6 = arith.constant 0 : index
    %c0_7 = arith.constant 0 : index
    %c0_8 = arith.constant 0 : index
    %16 = vector.load %arg3[%c0_6, %c0_7, %c0_8] : memref<1x8x128xf32, #tpu.memory_space<vmem>>, vector<1x8x128xf32>
    tpu.vector_store %arg3[%c0_6, %c0_7, %c0_8], %15 {strides = array<i32>} : memref<1x8x128xf32, #tpu.memory_space<vmem>>, vector<1x8x128xf32>,
    return
  }
  func.func @transform_0(%arg0: i32) -> (i32, i32) {
    %c0_i32 = arith.constant 0 : i32
    %c0_i32_0 = arith.constant 0 : i32
    return %arg0, %c0_i32 : i32, i32
  }
  func.func @transform_1(%arg0: i32) -> (i32, i32) {
    %c0_i32 = arith.constant 0 : i32
    %c0_i32_0 = arith.constant 0 : i32
    return %arg0, %c0_i32 : i32, i32
  }
  func.func @transform_2(%arg0: i32) -> (i32, i32, i32) {
    %c0_i32 = arith.constant 0 : i32
    %c0_i32_0 = arith.constant 0 : i32
    %c0_i32_1 = arith.constant 0 : i32
    return %arg0, %c0_i32, %c0_i32_0 : i32, i32, i32
  }
}

</mosaic_0001>

<bundles_post_ra>
// kernel: tpu_custom_call.1
= control target key start
LH: loop header
LB: loop body
LE: loop exit
PB: predicated region body
PF: predicated region fallthrough
CT: control target
= control target key end

     0   :  { %7 = vsyncpa [#allocation3], 0  ;;  %s202_s0 = inlined_call_operand.hbm [shape: f32[16,128], index: 0, kind: input, shape index: {}]   ;;  %s203_s1 = inlined_call_operand.hbm [shape: f32[16,128], index: 1, kind: input, shape index: {}]   ;;  %s204_s2 = inlined_call_operand.hbm [shape: f32[1,8,128], index: 2, kind: output, shape index: {}]  }
   0x1   :  { %8 = vsyncpa [#allocation6], 0 }
   0x2   :  { %9 = vsyncpa [#allocation4], 0  ;;  %s14_s11 = sshll.u32 %s202_s0, 4  ;;  %s173_s12 = smov [#allocation2]   ;;  %s15_s11 = int_to_ptr.hbm [resolvable:$true] %s14_s11 }
   0x3   :  { %s16_s13 = sshll.u32 %s173_s12, 4  ;;  %s27_s16 = sshll.u32 %s203_s1, 4  ;;  %s17_s13 = int_to_ptr.vmem [resolvable:$true] %s16_s13  ;;  %s28_s16 = int_to_ptr.hbm [resolvable:$true] %s27_s16 }
   0x4   :  { %s174_s17 = smov 128   ;;  %s175_s18 = smov 8  }
   0x5   :  { %22 = dma.hbm_to_vmem [thread:$0]  %s15_s11, 256, %s17_s13, [#allocation3], %s174_s17, %s174_s17, %s175_s18  }
   0x6   :  { %s176_s19 = smov [#allocation5]  }
   0x7   :  { %s29_s20 = sshll.u32 %s176_s19, 4  ;;  %s30_s20 = int_to_ptr.vmem [resolvable:$true] %s29_s20 }
   0x8   :  { %35 = dma.hbm_to_vmem [thread:$0]  %s28_s16, 256, %s30_s20, [#allocation6], %s174_s17, %s174_s17, %s175_s18  }
   0x9   :  { %167 = dma.done.wait [#allocation3], 256  }
   0xa   :  { %168 = vsyncadd [#allocation3], 4294967040 }
   0xb   :  { %169 = dma.done.wait [#allocation6], 256  }
   0xc   :  { %170 = vsyncadd [#allocation6], 4294967040  ;;  %v44_v0 = vld [vmem:[#allocation2] sm:$0xff]  ;;  %v45_v1 = vld [vmem:[#allocation2 + $0x8] sm:$0xff]  ;;  %s177_s0 = smov [#allocation7]   ;;  %s75_s23 = sshll.u32 %s204_s2, 4  ;;  %s76_s23 = int_to_ptr.hbm [resolvable:$true] %s75_s23 }
   0xd   :  { %v48_v2 = vmul.f32 0.5, %v44_v0  ;;  %v49_v3 = vmul.f32 0.5, %v45_v1  ;;  %v46_v7 = vld [vmem:[#allocation5] sm:$0xff]  ;;  %v47_v9 = vld [vmem:[#allocation5 + $0x8] sm:$0xff]  ;;  %s73_s1 = sshll.u32 %s177_s0, 4  ;;  %s74_s1 = int_to_ptr.vmem [resolvable:$true] %s73_s1 }
   0xf   :  { %91 = vtanh.f32 %v48_v2 }
  0x10   :  { %93 = vtanh.f32 %v49_v3 }
  0x15   :  { %v92_v4 = vpop.eup %91 }
  0x16   :  { %v94_v5 = vpop.eup %93  ;;  %v52_v6 = vmul.f32 0.5, %v92_v4 }
  0x17   :  { %v53_v8 = vmul.f32 0.5, %v94_v5 }
  0x18   :  { %v54_v10 = vadd.f32 0.5, %v52_v6 }
  0x19   :  { %v55_v11 = vadd.f32 0.5, %v53_v8 }
  0x1a   :  { %v56_v12 = vsub.f32 %v46_v7, %v54_v10 }
  0x1b   :  { %v57_v13 = vsub.f32 %v47_v9, %v55_v11 }
  0x1c   :  { %v58_v14 = vmul.f32 %v56_v12, %v56_v12 }
  0x1d   :  { %v59_v15 = vmul.f32 %v57_v13, %v57_v13 }
  0x1f   :  { %v60_v16 = vadd.f32 %v59_v15, %v58_v14 }
  0x21   :  { %v61_v17 = vrot.slane %v60_v16, 4 }
  0x23   :  { %v62_v18 = vadd.f32 %v61_v17, %v60_v16 }
  0x25   :  { %v63_v19 = vrot.slane %v62_v18, 2 }
  0x27   :  { %v64_v20 = vadd.f32 %v63_v19, %v62_v18 }
  0x29   :  { %v65_v21 = vrot.slane %v64_v20, 1 }
  0x2b   :  { %v66_v22 = vadd.f32 %v65_v21, %v64_v20 }
  0x2d   :  { %67 = vst [vmem:[#allocation7] sm:$0xff] %v66_v22 }
  0x2e   :  { %78 = dma.vmem_to_hbm [thread:$0]  %s74_s1, 128, %s76_s23, [#allocation4]  }
  0x2f   :  { %171 = dma.done.wait [#allocation4], 128  }
  0x30   :  { %172 = vsyncadd [#allocation4], 4294967168 }
  0x31   :  { %83 = vsyncpa [#allocation3], 1 }
  0x32   :  { %84 = vsyncpa [#allocation6], 1 }
  0x33   :  { %85 = vsyncpa [#allocation4], 1 }

</bundles_post_ra>
